<compile_context>
chip_gen: v7x
topology: tpu7x:2x2x1
jax: 0.10.0
libtpu: 0.0.40
codegen_flags: <defaults>
</compile_context>

<pallas_src>
import jax
import jax.numpy as jnp
from jax.experimental import pallas as pl
from jax.experimental.pallas import tpu as pltpu

N_CLASS = 3
C_PAD = 128          # class dim padded to one full lane register
LOSS_LANE = N_CLASS  # padded lane that carries the per-sample CE loss
_VMEM_BUDGET = 12 * 1024 * 1024  # keep under v5e's 16 MiB scoped default w/ headroom


def _round_up(x, m):
    return (x + m - 1) // m * m


def _cdiv(a, b):
    return (a + b - 1) // b


def _pick_tile(batch, hidden, itemsize):
    """Rows per grid step (static, shape-derived).

    Targets ~8 grid steps so the strided CLS gather pipelines behind compute
    (and >=2 tiles shard across v7x's two TCs), rows a multiple of 16 for bf16
    sublane packing, at most 512 rows, and a footprint of
      2*tb*hidden*itemsize (CLS dbl-buf) + 2*H*128*2 (weight) + 2*tb*128*4 (out)
      + 2*tb*128*4 (labels, lane-padded)
    under _VMEM_BUDGET.
    """
    fixed = 2 * hidden * C_PAD * 2 + 2 * C_PAD * 4            # weight + bias copies
    per_row = 2 * hidden * itemsize + 2 * C_PAD * 4 + 2 * C_PAD * 4
    cap = max((_VMEM_BUDGET - fixed) // per_row, 16) // 16 * 16
    tb = _round_up(max(_cdiv(batch, 8), 1), 16)               # aim for ~8 grid steps
    tb = min(tb, 512, cap)
    return max(tb, 16)


def _cb_head_kernel(labels_ref, w_ref, b_ref, cls_ref, out_ref):
    """Classification head + per-sample cross-entropy for one batch tile.

    labels_ref : [tb, 1]     int32   (VMEM, -100 on padded rows)
    w_ref      : [H, C_PAD]  bf16    (linear weight, zero-padded classes, resident)
    b_ref      : [1, C_PAD]  f32     (linear bias, zero-padded, resident)
    cls_ref    : [tb, H]     bf16    (auto-pipelined CLS rows: first H lanes of
                                      each row of the [B, S*H] view)
    out_ref    : [tb, C_PAD] f32     (lanes 0..2 = logits, lane 3 = CE loss)
    """
    # TODO(synk): nn.Dropout(p=hidden_dropout_prob) is modeled in eval mode
    # (identity); a training-mode forward would draw a mask with pltpu.prng_*.

    # MXU: [tb, H](bf16) @ [H, 128](bf16) -> f32 accumulate, plus bias.
    logits = jnp.dot(cls_ref[...], w_ref[...],
                     preferred_element_type=jnp.float32)
    logits = logits + b_ref[...]

    lane = jax.lax.broadcasted_iota(jnp.int32, logits.shape, 1)
    labels = labels_ref[...]                       # [tb, 1] int32

    # Cross-entropy with padded classes masked out of the log-sum-exp.
    neg_big = jnp.float32(-1e30)
    masked = jnp.where(lane < N_CLASS, logits, neg_big)
    m = jnp.max(masked, axis=-1, keepdims=True)
    lse = m + jnp.log(jnp.sum(jnp.exp(masked - m), axis=-1, keepdims=True))
    picked = jnp.sum(jnp.where(lane == labels, logits, 0.0),
                     axis=-1, keepdims=True)
    per_sample = lse - picked                      # [tb, 1]

    # Pack per-sample loss into padded lane LOSS_LANE of the lane-dense output.
    out_ref[...] = jnp.where(lane == LOSS_LANE, per_sample, logits)


def prepare_cb_head_params(weight, bias, hidden_dtype=jnp.bfloat16):
    """Pad/transpose the nn.Linear(H, 3) parameters ONCE, outside the hot path.

    Invariant relied on by the kernel: columns N_CLASS..127 of w_pad and b_pad
    are exactly zero (padded-class logits are finite and get masked in the LSE).
    """
    h = weight.shape[1]
    w_pad = (jnp.zeros((h, C_PAD), hidden_dtype)
             .at[:, :N_CLASS].set(weight.T.astype(hidden_dtype)))
    b_pad = (jnp.zeros((1, C_PAD), jnp.float32)
             .at[0, :N_CLASS].set(bias.astype(jnp.float32)))
    return w_pad, b_pad


@jax.jit
def cb_model_forward(last_hidden_state, labels, w_pad, b_pad):
    """CbModel.forward hot path (post-LM): returns (logits, loss, labels).

    last_hidden_state : [B, S, H] bf16/f32 (LM output); H must be a multiple of 128
    labels            : [B]       int32
    w_pad, b_pad      : from prepare_cb_head_params (called once per param set)
    """
    B, S, H = last_hidden_state.shape
    assert H % 128 == 0, "hidden_size must be a multiple of 128"

    tb = _pick_tile(B, H, jnp.dtype(last_hidden_state.dtype).itemsize)
    nb = _cdiv(B, tb)

    # Free, contiguous metadata reshape: row b of lhs2d starts with the CLS
    # vector last_hidden_state[b, 0, :].  The BlockSpec below reads only the
    # first H lanes of each of tb rows (a strided rectangular window), and
    # Pallas auto-double-buffers that DMA across grid steps.
    lhs2d = last_hidden_state.reshape(B, S * H)

    labels_pad = (jnp.full((nb * tb, 1), -100, jnp.int32)
                  .at[:B, 0].set(labels.astype(jnp.int32)))

    out = pl.pallas_call(
        _cb_head_kernel,
        out_shape=jax.ShapeDtypeStruct((nb * tb, C_PAD), jnp.float32),
        grid_spec=pltpu.PrefetchScalarGridSpec(
            num_scalar_prefetch=0,
            grid=(nb,),
            in_specs=[
                pl.BlockSpec((tb, 1), lambda i: (i, 0)),      # labels (per tile)
                pl.BlockSpec((H, C_PAD), lambda i: (0, 0)),   # weight (resident)
                pl.BlockSpec((1, C_PAD), lambda i: (0, 0)),   # bias (resident)
                pl.BlockSpec((tb, H), lambda i: (i, 0)),      # CLS rows (pipelined gather)
            ],
            out_specs=pl.BlockSpec((tb, C_PAD), lambda i: (i, 0)),
        ),
        compiler_params=pltpu.CompilerParams(
            dimension_semantics=("parallel",),     # shards batch tiles across v7x TCs
            vmem_limit_bytes=32 * 1024 * 1024),
    )(labels_pad, w_pad, b_pad, lhs2d)

    # Rows >= B of `out` come from padded/undefined CLS rows; slice them away.
    logits = out[:B, :N_CLASS]
    per_sample = out[:B, LOSS_LANE]
    # torch.nn.CrossEntropyLoss default: mean over non-ignored (-100) samples.
    valid = labels >= 0
    denom = jnp.maximum(jnp.sum(valid.astype(jnp.float32)), 1.0)
    loss = jnp.sum(jnp.where(valid, per_sample, 0.0)) / denom
    return logits, loss, labels


def _run_case(seed, B, S, H):
    key = jax.random.PRNGKey(seed)
    k_h, k_w, k_b, k_l = jax.random.split(key, 4)

    # LM output in bf16 (typical pretrained-LM activation dtype).
    last_hidden_state = jax.random.normal(
        k_h, (B, S, H), dtype=jnp.float32).astype(jnp.bfloat16)
    labels = jax.random.randint(k_l, (B,), 0, N_CLASS, dtype=jnp.int32)

    # Deterministic nn.Linear(hidden_size, 3) parameters.
    bound = 1.0 / float(H) ** 0.5
    weight = jax.random.uniform(k_w, (N_CLASS, H), jnp.float32, -bound, bound)
    bias = jax.random.uniform(k_b, (N_CLASS,), jnp.float32, -bound, bound)

    # Parameter padding happens once, outside the per-forward hot path.
    w_pad, b_pad = prepare_cb_head_params(
        weight, bias, hidden_dtype=last_hidden_state.dtype)

    logits, loss, out_labels = cb_model_forward(
        last_hidden_state, labels, w_pad, b_pad)
    jax.block_until_ready((logits, loss, out_labels))

    # Pure-JAX reference of the head (same bf16 inputs, f32 math).
    cls_ref = last_hidden_state[:, 0, :].astype(jnp.float32)
    w_ref = weight.astype(last_hidden_state.dtype).astype(jnp.float32)
    logits_ref = cls_ref @ w_ref.T + bias
    lse_ref = jax.nn.logsumexp(logits_ref, axis=-1)
    picked_ref = jnp.take_along_axis(logits_ref, labels[:, None], axis=-1)[:, 0]
    loss_ref = jnp.mean(lse_ref - picked_ref)

    assert logits.shape == (B, N_CLASS)
    assert jnp.allclose(logits, logits_ref, atol=1e-3), "logits mismatch"
    assert jnp.allclose(loss, loss_ref, atol=1e-3), "loss mismatch"
    assert jnp.array_equal(out_labels, labels), "labels passthrough mismatch"


if __name__ == "__main__":
    # Single-tile case at small shapes consistent with the module's forward.
    _run_case(0, B=16, S=8, H=128)
    # Multi-tile case: 3 pipelined grid steps with a ragged last batch tile.
    _run_case(0, B=40, S=4, H=256)
    print("KERNEL_OK")
</pallas_src>

<mosaic_0001>
module attributes {stable_mosaic.version = 11 : i64} {
  func.func @_cb_head_kernel(%arg0: i32, %arg1: memref<16x1xi32, #tpu.memory_space<vmem>>, %arg2: memref<128x128xbf16, #tpu.memory_space<vmem>>, %arg3: memref<1x128xf32, #tpu.memory_space<vmem>>, %arg4: memref<16x128xbf16, #tpu.memory_space<vmem>>, %arg5: memref<16x128xf32, #tpu.memory_space<vmem>>) attributes {dimension_semantics = [#tpu.dimension_semantics<parallel>], iteration_bounds = array<i64: 1>, scalar_prefetch = 0 : i64, scratch_operands = 0 : i64, tpu.core_type = #tpu.core_type<tc>, window_params = [{transform_indices = @transform_0, window_bounds = array<i64: 16, 1>}, {pipeline_mode = #tpu.pipeline_mode<synchronous>, transform_indices = @transform_1, window_bounds = array<i64: 128, 128>}, {pipeline_mode = #tpu.pipeline_mode<synchronous>, transform_indices = @transform_2, window_bounds = array<i64: 1, 128>}, {transform_indices = @transform_3, window_bounds = array<i64: 16, 128>}, {transform_indices = @transform_4, window_bounds = array<i64: 16, 128>}]} {
    %c0 = arith.constant 0 : index
    %c0_0 = arith.constant 0 : index
    %0 = vector.load %arg4[%c0, %c0_0] : memref<16x128xbf16, #tpu.memory_space<vmem>>, vector<16x128xbf16>
    %c0_1 = arith.constant 0 : index
    %c0_2 = arith.constant 0 : index
    %1 = vector.load %arg2[%c0_1, %c0_2] : memref<128x128xbf16, #tpu.memory_space<vmem>>, vector<128x128xbf16>
    %cst = arith.constant dense<0.000000e+00> : vector<16x128xf32>
    %2 = tpu.matmul %0, %1, %cst {dimension_numbers = #tpu.dot_dimension_numbers<[1], [0], [0], [1], [0, 0, 1, 1], [], []>} : vector<16x128xbf16>, vector<128x128xbf16>, vector<16x128xf32> -> vector<16x128xf32>
    %c0_3 = arith.constant 0 : index
    %c0_4 = arith.constant 0 : index
    %3 = vector.load %arg3[%c0_3, %c0_4] : memref<1x128xf32, #tpu.memory_space<vmem>>, vector<1x128xf32>
    %4 = vector.broadcast %3 : vector<1x128xf32> to vector<16x128xf32>
    %5 = arith.addf %2, %4 : vector<16x128xf32>
    %6 = tpu.iota {dimensions = array<i32: 1>} : vector<16x128xi32>
    %c0_5 = arith.constant 0 : index
    %c0_6 = arith.constant 0 : index
    %7 = vector.load %arg1[%c0_5, %c0_6] : memref<16x1xi32, #tpu.memory_space<vmem>>, vector<16x1xi32>
    %c3_i32 = arith.constant 3 : i32
    %8 = vector.broadcast %c3_i32 : i32 to vector<16x128xi32>
    %9 = arith.cmpi slt, %6, %8 : vector<16x128xi32>
    %cst_7 = arith.constant -1.000000e+30 : f32
    %10 = vector.broadcast %cst_7 : f32 to vector<16x128xf32>
    %11 = arith.select %9, %5, %10 : vector<16x128xi1>, vector<16x128xf32>
    %cst_8 = arith.constant dense<0xFF800000> : vector<16xf32>
    %12 = vector.multi_reduction <maximumf>, %11, %cst_8 [1] : vector<16x128xf32> to vector<16xf32>
    %13 = vector.shape_cast %12 : vector<16xf32> to vector<16x1xf32>
    %14 = vector.broadcast %13 : vector<16x1xf32> to vector<16x128xf32>
    %15 = arith.subf %11, %14 : vector<16x128xf32>
    %16 = math.exp %15 : vector<16x128xf32>
    %cst_9 = arith.constant dense<0.000000e+00> : vector<16xf32>
    %17 = vector.multi_reduction <add>, %16, %cst_9 [1] : vector<16x128xf32> to vector<16xf32>
    %18 = vector.shape_cast %17 : vector<16xf32> to vector<16x1xf32>
    %19 = math.log %18 : vector<16x1xf32>
    %20 = arith.addf %13, %19 : vector<16x1xf32>
    %21 = vector.broadcast %7 : vector<16x1xi32> to vector<16x128xi32>
    %22 = arith.cmpi eq, %6, %21 : vector<16x128xi32>
    %cst_10 = arith.constant 0.000000e+00 : f32
    %23 = vector.broadcast %cst_10 : f32 to vector<16x128xf32>
    %24 = arith.select %22, %5, %23 : vector<16x128xi1>, vector<16x128xf32>
    %cst_11 = arith.constant dense<0.000000e+00> : vector<16xf32>
    %25 = vector.multi_reduction <add>, %24, %cst_11 [1] : vector<16x128xf32> to vector<16xf32>
    %26 = vector.shape_cast %25 : vector<16xf32> to vector<16x1xf32>
    %27 = arith.subf %20, %26 : vector<16x1xf32>
    %c3_i32_12 = arith.constant 3 : i32
    %28 = vector.broadcast %c3_i32_12 : i32 to vector<16x128xi32>
    %29 = arith.cmpi eq, %6, %28 : vector<16x128xi32>
    %30 = vector.shape_cast %27 : vector<16x1xf32> to vector<16x1xf32>
    %31 = vector.broadcast %30 : vector<16x1xf32> to vector<16x128xf32>
    %32 = arith.select %29, %31, %5 : vector<16x128xi1>, vector<16x128xf32>
    %c0_13 = arith.constant 0 : index
    %c0_14 = arith.constant 0 : index
    %33 = vector.load %arg5[%c0_13, %c0_14] : memref<16x128xf32, #tpu.memory_space<vmem>>, vector<16x128xf32>
    tpu.vector_store %arg5[%c0_13, %c0_14], %32 {strides = array<i32>} : memref<16x128xf32, #tpu.memory_space<vmem>>, vector<16x128xf32>,
    return
  }
  func.func @transform_0(%arg0: i32) -> (i32, i32) {
    %c0_i32 = arith.constant 0 : i32
    %c0_i32_0 = arith.constant 0 : i32
    return %arg0, %c0_i32 : i32, i32
  }
  func.func @transform_1(%arg0: i32) -> (i32, i32) {
    %c0_i32 = arith.constant 0 : i32
    %c0_i32_0 = arith.constant 0 : i32
    %c0_i32_1 = arith.constant 0 : i32
    return %c0_i32, %c0_i32_0 : i32, i32
  }
  func.func @transform_2(%arg0: i32) -> (i32, i32) {
    %c0_i32 = arith.constant 0 : i32
    %c0_i32_0 = arith.constant 0 : i32
    %c0_i32_1 = arith.constant 0 : i32
    return %c0_i32, %c0_i32_0 : i32, i32
  }
  func.func @transform_3(%arg0: i32) -> (i32, i32) {
    %c0_i32 = arith.constant 0 : i32
    %c0_i32_0 = arith.constant 0 : i32
    return %arg0, %c0_i32 : i32, i32
  }
  func.func @transform_4(%arg0: i32) -> (i32, i32) {
    %c0_i32 = arith.constant 0 : i32
    %c0_i32_0 = arith.constant 0 : i32
    return %arg0, %c0_i32 : i32, i32
  }
}

</mosaic_0001>

<bundles_post_ra>
// kernel: cb_model_forward.1
= control target key start
LH: loop header
LB: loop body
LE: loop exit
PB: predicated region body
PF: predicated region fallthrough
CT: control target
= control target key end

     0   :  { %v300_v1 = vmov 0.0   ;;  %vm301_vm0 = vmmov 0   ;;  %v302_v3 = vmov 0   ;;  %v183_v15 = vlaneseq  ;;  %s373_s0 = inlined_call_operand.vmem [shape: s32[16,1], index: 0, kind: input, shape index: {}]   ;;  %s374_s1 = inlined_call_operand.vmem [shape: bf16[128,128], index: 1, kind: input, shape index: {}]   ;;  %s375_s2 = inlined_call_operand.vmem [shape: f32[1,128], index: 2, kind: input, shape index: {}]   ;;  %s376_s3 = inlined_call_operand.vmem [shape: bf16[16,1024], index: 3, kind: input, shape index: {}]   ;;  %s377_s4 = inlined_call_operand.vmem [shape: f32[16,128], index: 4, kind: output, shape index: {}]  }
   0x1   :  { %v283_v0 = vld [vmem:[%s374_s1] sm:$0xff]   ;;  %258 = vmatprep.subr.bf16.mxu0 %v300_v1  ;;  %v284_v2 = vld [vmem:[%s374_s1 + $0x8] sm:$0xff]   ;;  %274 = vmatprep.mubr.msk.bf16.mxu0 %vm301_vm0, %v300_v1  ;;  %v285_v4 = vld [vmem:[%s374_s1 + $0x10] sm:$0xff]  }
   0x2   :  { %259 = vmatpush3.bf16.msra.mxu0 %v283_v0  ;;  %281 = vset.pattern.permute.xlu1 %v302_v3  ;;  %v32_v5 = vld [vmem:[%s376_s3] sm:$0xf]  ;;  %v286_v8 = vld [vmem:[%s374_s1 + $0x18] sm:$0xff]   ;;  %v186_v9 = vld [vmem:[%s373_s0 + $0x8] sm:$0xff]  ;;  %v184_v16 = vand.u32 127, %v183_v15 }
   0x3   :  { %260 = vmatprep.subr.bf16.mxu0 %v300_v1  ;;  %282 = vset.pattern.permute.xlu0 %v302_v3  ;;  %v34_v6 = vld [vmem:[%s376_s3 + $0x20] sm:$0xf]  ;;  %33 = vst [vmem:[#allocation2] sm:$0xf] %v32_v5  ;;  %v288_v11 = vld [vmem:[%s374_s1 + $0x28] sm:$0xff]   ;;  %v289_v12 = vld [vmem:[%s374_s1 + $0x30] sm:$0xff]  }
   0x4   :  { %v185_v7 = vld [vmem:[%s373_s0] sm:$0xff]  ;;  %35 = vst [vmem:[#allocation2 + $0x4] sm:$0xf] %v34_v6  ;;  %v290_v13 = vld [vmem:[%s374_s1 + $0x38] sm:$0xff]   ;;  %vm187_vm1 = vcmp.lt.s32.totalorder %v184_v16, 3  ;;  %vm226_vm4 = vcmp.eq.s32.totalorder %v184_v16, 3 }
   0x5   :  { %211 = vperm.xlu1 %281, %v185_v7   ;;  %v287_v10 = vld [vmem:[%s374_s1 + $0x20] sm:$0xff]  }
   0x6   :  { %261 = vmatpush3.bf16.msra.mxu0 %v284_v2  ;;  %v239_v17 = vld [vmem:[%s375_s2] ss:$0 sm:$0xff] }
   0x7   :  { %262 = vmatprep.subr.bf16.mxu0 %v300_v1 }
   0x9   :  { %214 = vperm.xlu1 %281, %v186_v9  }
   0xa   :  { %263 = vmatpush3.bf16.msra.mxu0 %v285_v4 }
   0xb   :  { %264 = vmatprep.subr.bf16.mxu0 %v300_v1  ;;  %v291_v14 = vld [vmem:[#allocation2] sm:$0xff]  }
   0xe   :  { %265 = vmatpush3.bf16.msra.mxu0 %v286_v8 }
   0xf   :  { %266 = vmatprep.subr.bf16.mxu0 %v300_v1 }
  0x12   :  { %267 = vmatpush3.bf16.msra.mxu0 %v287_v10 }
  0x13   :  { %268 = vmatprep.subr.bf16.mxu0 %v300_v1 }
  0x16   :  { %269 = vmatpush3.bf16.msra.mxu0 %v288_v11 }
  0x17   :  { %270 = vmatprep.subr.bf16.mxu0 %v300_v1 }
  0x1a   :  { %271 = vmatpush3.bf16.msra.mxu0 %v289_v12 }
  0x1b   :  { %272 = vmatprep.subr.bf16.mxu0 %v300_v1 }
  0x1e   :  { %273 = vmatpush3.bf16.msra.mxu0 %v290_v13 }
  0x21   :  { %275 = vmatmul.mubr.bf16.vlgmr.msra.gmra.mrb[0].mxu0 %v291_v14 }
  0x84   :  { %v212_v32 = vpop.permute.xlu1 %211 }
  0x85   :  { %vm216_vm2 = vcmp.eq.s32.totalorder %v184_v16, %v212_v32 }
  0x88   :  { %v215_v34 = vpop.permute.xlu1 %214 }
  0x89   :  { %vm217_vm3 = vcmp.eq.s32.totalorder %v184_v16, %v215_v34 }
  0xf4   :  { %v176_v18 = vpop.f32.mrb[0].mxu0 }
  0xf5   :  { %v177_v19 = vadd.f32 %v239_v17, %v176_v18  ;;  %v276_v20 = vpop.f32.mrb[1].mxu0 }
  0xf6   :  { %v179_v21 = vpop.f32.mrb[2].mxu0 }
  0xf7   :  { %v180_v22 = vadd.f32 %v239_v17, %v179_v21  ;;  %v277_v23 = vpop.f32.mrb[3].mxu0  ;;  %v188_v24 = vsel %vm187_vm1, %v177_v19, -1e+30  ;;  %v218_v36 = vsel %vm216_vm2, %v177_v19, 0.0 }
  0xf8   :  { %190 = vmax.xlane.f32.xlu0 %v188_v24 }
  0xf9   :  { %v189_v25 = vsel %vm187_vm1, %v180_v22, -1e+30  ;;  %v219_v37 = vsel %vm217_vm3, %v180_v22, 0.0 }
  0xfc   :  { %192 = vmax.xlane.f32.xlu0 %v189_v25 }
 0x185   :  { %v191_v26 = vpop.xlane.xlu0 %190 }
 0x186   :  { %v194_v27 = vsub.f32 %v188_v24, %v191_v26 }
 0x188   :  { %v196_v28 = vmul.f32 1.442695, %v194_v27 }
 0x189   :  { %v193_v29 = vpop.xlane.xlu0 %192 }
 0x18a   :  { %292 = vpow2.f32 %v196_v28  ;;  %v195_v30 = vsub.f32 %v189_v25, %v193_v29 }
 0x18c   :  { %v198_v31 = vmul.f32 1.442695, %v195_v30 }
 0x18e   :  { %294 = vpow2.f32 %v198_v31 }
 0x194   :  { %v293_v33 = vpop.eup %292 }
 0x195   :  { %200 = vadd.xlane.f32.xlu0 %v293_v33 }
 0x198   :  { %v295_v35 = vpop.eup %294 }
 0x199   :  { %220 = vadd.xlane.f32.xlu0 %v218_v36  ;;  %202 = vadd.xlane.f32.xlu1 %v295_v35 }
 0x19d   :  { %222 = vadd.xlane.f32.xlu0 %v219_v37 }
 0x222   :  { %v201_v38 = vpop.xlane.xlu0 %200 }
 0x223   :  { %296 = vlog2.f32 %v201_v38 }
 0x226   :  { %v203_v39 = vpop.xlane.xlu1 %202  ;;  %v221_v42 = vpop.xlane.xlu0 %220 }
 0x227   :  { %298 = vlog2.f32 %v203_v39 }
 0x22a   :  { %v223_v49 = vpop.xlane.xlu0 %222 }
 0x22d   :  { %v297_v40 = vpop.eup %296 }
 0x22e   :  { %v205_v41 = vmul.f32 0.6931472, %v297_v40 }
 0x230   :  { %v208_v43 = vadd.f32 %v205_v41, %v191_v26 }
 0x231   :  { %v299_v44 = vpop.eup %298 }
 0x232   :  { %v207_v45 = vmul.f32 0.6931472, %v299_v44  ;;  %v224_v46 = vsub.f32 %v208_v43, %v221_v42 }
 0x234   :  { %v227_v47 = vsel %vm226_vm4, %v224_v46, %v177_v19  ;;  %v209_v48 = vadd.f32 %v207_v45, %v193_v29 }
 0x235   :  { %229 = vst [vmem:[%s377_s4] sm:$0xff] %v227_v47 }
 0x236   :  { %v225_v50 = vsub.f32 %v209_v48, %v223_v49 }
 0x238   :  { %v228_v51 = vsel %vm226_vm4, %v225_v50, %v180_v22 }
 0x239   :  { %230 = vst [vmem:[%s377_s4 + $0x8] sm:$0xff] %v228_v51 }

</bundles_post_ra>
